<compile_context>
chip_gen: v6e
topology: v6e:2x2x1
jax: 0.10.0
libtpu: 0.0.40
codegen_flags: <defaults>
</compile_context>

<pallas_src>
import math
from functools import partial

import jax
import jax.numpy as jnp
from jax.experimental import pallas as pl
from jax.experimental.pallas import tpu as pltpu


def mha_kernel(x_ref, wq_ref, bq_ref, wk_ref, bk_ref, wv_ref, bv_ref,
               wo_ref, bo_ref, o_ref, kt_scr, v_scr, *,
               num_heads, head_dim, q_tile, valid_len):
    H, Dh = num_heads, head_dim
    qi = pl.program_id(1)
    s_pad = x_ref.shape[0]          # padded sequence length (static)

    # --- K/V projections: once per batch element, cached head-major in VMEM. ---
    @pl.when(qi == 0)
    def _():
        x_kv = x_ref[...]                                               # (S_pad, D) bf16
        k = jnp.dot(x_kv, wk_ref[...], preferred_element_type=jnp.float32) + bk_ref[...]
        v = jnp.dot(x_kv, wv_ref[...], preferred_element_type=jnp.float32) + bv_ref[...]
        k = jnp.transpose(k.reshape(s_pad, H, Dh), (1, 0, 2))           # (H, S, Dh) f32
        # K kept transposed (H, Dh, S): lane-dense (S_pad % 128 == 0 at real shapes)
        # and already in (contract, N) MXU layout for the score matmul.
        kt_scr[...] = jnp.swapaxes(k, 1, 2).astype(kt_scr.dtype)        # (H, Dh, S) bf16
        v_scr[...] = jnp.transpose(v.reshape(s_pad, H, Dh), (1, 0, 2)).astype(v_scr.dtype)

    # --- Q projection for this Q-row tile (1/sqrt(Dh) pre-folded into wq/bq). ---
    row0 = pl.multiple_of(qi * q_tile, q_tile)
    x_q = x_ref[pl.ds(row0, q_tile), :]                                 # (tq, D) bf16
    q = jnp.dot(x_q, wq_ref[...], preferred_element_type=jnp.float32) + bq_ref[...]
    q3 = jnp.transpose(q.reshape(q_tile, H, Dh), (1, 0, 2)).astype(x_q.dtype)  # (H, tq, Dh)

    # --- Scores for all heads at once; mask padded keys before the softmax. ---
    s = jnp.einsum("hqd,hds->hqs", q3, kt_scr[...],
                   preferred_element_type=jnp.float32)                  # (H, tq, S_pad)
    if valid_len < s_pad:   # static: only emitted when the sequence was padded
        key_pos = jax.lax.broadcasted_iota(jnp.int32, (1, 1, s_pad), 2)
        s = jnp.where(key_pos < valid_len, s, -1e30)
    s = s - jnp.max(s, axis=-1, keepdims=True)
    p = jnp.exp(s)
    # approx reciprocal (EUP) deviates from exact SDPA by ~1e-3 relative; covered by
    # the test tolerance.
    p = p * pl.reciprocal(jnp.sum(p, axis=-1, keepdims=True), approx=True)

    # --- P @ V for all heads, merge heads, output projection. ---
    ctx = jnp.einsum("hqk,hkd->hqd", p.astype(v_scr.dtype), v_scr[...],
                     preferred_element_type=jnp.float32)                # (H, tq, Dh)
    attn = jnp.transpose(ctx, (1, 0, 2)).reshape(q_tile, H * Dh)        # (tq, D)
    out = jnp.dot(attn.astype(wo_ref.dtype), wo_ref[...],
                  preferred_element_type=jnp.float32) + bo_ref[...]
    o_ref[...] = out.astype(o_ref.dtype)                                # lane-dense store


def _choose_tiling(seq_len, max_q_tile=None):
    """Generation-aware (q_tile, padded_seq_len, vmem_limit_bytes)."""
    try:
        info = pltpu.get_tpu_info()
        vmem_cap = getattr(info, "vmem_capacity_bytes", 0) or 0
    except Exception:
        vmem_cap = 0
    if vmem_cap >= 96 * 1024 * 1024:           # v5e / v6e: 128 MiB VMEM per core
        tq_max, vmem_limit = 512, 100 * 1024 * 1024
    else:                                       # v7x (64 MiB) or unknown: conservative
        tq_max, vmem_limit = 256, 48 * 1024 * 1024
    if max_q_tile is not None:
        tq_max = max_q_tile
    if seq_len <= tq_max:
        return seq_len, seq_len, vmem_limit     # single whole-sequence Q tile
    s_pad = -(-seq_len // 128) * 128            # lane-dense key dim (577 -> 640)
    tq = max(c for c in range(8, min(tq_max, s_pad) + 1, 8) if s_pad % c == 0)
    return tq, s_pad, vmem_limit


def mhdpa_forward(x, wq, bq, wk, bk, wv, bv, wo, bo, *, num_heads, max_q_tile=None):
    B, S, D = x.shape
    head_dim = D // num_heads
    out_dtype = x.dtype

    tq, s_pad, vmem_limit = _choose_tiling(S, max_q_tile)
    n_qt = s_pad // tq

    # Fold the SDPA scale into the Q projection (in f32, before the bf16 cast).
    scale = 1.0 / math.sqrt(head_dim)
    wq = wq.astype(jnp.float32) * scale
    bq = bq.astype(jnp.float32) * scale

    # bf16 matmul operands everywhere (f32 accumulation in-kernel); f32 biases.
    x_in = x.astype(jnp.bfloat16)
    if s_pad != S:
        x_in = jnp.pad(x_in, ((0, 0), (0, s_pad - S), (0, 0)))
    wq, wk, wv, wo = (w.astype(jnp.bfloat16) for w in (wq, wk, wv, wo))
    bq, bk, bv, bo = (b.astype(jnp.float32).reshape(1, -1) for b in (bq, bk, bv, bo))

    # Constant-index weight/bias blocks: single-buffered (saves a weight copy of VMEM).
    def const_spec(a):
        return pl.BlockSpec(a.shape, lambda b, qi: (0,) * a.ndim,
                            pipeline_mode=pl.Buffered(1))

    out = pl.pallas_call(
        partial(mha_kernel, num_heads=num_heads, head_dim=head_dim,
                q_tile=tq, valid_len=S),
        out_shape=jax.ShapeDtypeStruct((B, s_pad, D), out_dtype),
        grid_spec=pltpu.PrefetchScalarGridSpec(
            num_scalar_prefetch=0,
            grid=(B, n_qt),
            in_specs=[
                # Single x input: the K/V slab; Q rows are sliced from it in-kernel.
                pl.BlockSpec((None, s_pad, D), lambda b, qi: (b, 0, 0)),
                const_spec(wq), const_spec(bq),
                const_spec(wk), const_spec(bk),
                const_spec(wv), const_spec(bv),
                const_spec(wo), const_spec(bo),
            ],
            out_specs=pl.BlockSpec((None, tq, D), lambda b, qi: (b, qi, 0)),
            scratch_shapes=[
                pltpu.VMEM((num_heads, head_dim, s_pad), jnp.bfloat16),  # K^T cache
                pltpu.VMEM((num_heads, s_pad, head_dim), jnp.bfloat16),  # V cache
            ],
        ),
        compiler_params=pltpu.CompilerParams(
            # batch is parallel (megacore); Q-tile axis carries the K/V scratch.
            dimension_semantics=("parallel", "arbitrary"),
            vmem_limit_bytes=vmem_limit,
        ),
    )(x_in, wq, bq, wk, bk, wv, bv, wo, bo)

    return out[:, :S, :] if s_pad != S else out


def reference_forward(x, wq, bq, wk, bk, wv, bv, wo, bo, *, num_heads):
    B, S, D = x.shape
    Dh = D // num_heads
    q = (x @ wq + bq).reshape(B, S, num_heads, Dh)
    k = (x @ wk + bk).reshape(B, S, num_heads, Dh)
    v = (x @ wv + bv).reshape(B, S, num_heads, Dh)
    s = jnp.einsum("bqhd,bkhd->bhqk", q, k) / math.sqrt(Dh)
    p = jax.nn.softmax(s, axis=-1)
    o = jnp.einsum("bhqk,bkhd->bqhd", p, v).reshape(B, S, D)
    return o @ wo + bo


if __name__ == "__main__":
    def make_inputs(key, B, S, D):
        ks = jax.random.split(key, 9)
        sc = 0.05
        x  = jax.random.normal(ks[0], (B, S, D), jnp.float32)
        wq = sc * jax.random.normal(ks[1], (D, D), jnp.float32)
        bq = sc * jax.random.normal(ks[2], (1, D), jnp.float32)
        wk = sc * jax.random.normal(ks[3], (D, D), jnp.float32)
        bk = sc * jax.random.normal(ks[4], (1, D), jnp.float32)
        wv = sc * jax.random.normal(ks[5], (D, D), jnp.float32)
        bv = sc * jax.random.normal(ks[6], (1, D), jnp.float32)
        wo = sc * jax.random.normal(ks[7], (D, D), jnp.float32)
        bo = sc * jax.random.normal(ks[8], (1, D), jnp.float32)
        return x, wq, bq, wk, bk, wv, bv, wo, bo

    # Small "VisionBackboneConfig": hidden=32, heads=4 -> head_dim=8.
    D, H = 32, 4

    # Test 1: single whole-sequence Q tile (no padding path).
    args = make_inputs(jax.random.PRNGKey(0), 2, 8, D)
    out = jax.block_until_ready(mhdpa_forward(*args, num_heads=H))
    ref = reference_forward(*args, num_heads=H)
    assert out.shape == (2, 8, D)
    err = float(jnp.max(jnp.abs(out - ref)))
    assert jnp.allclose(out, ref, atol=2.5e-2, rtol=2.5e-2), f"max abs err {err}"

    # Test 2: forces the padded / masked-key / multi-Q-tile path (S=40 -> 128, tq=16).
    args2 = make_inputs(jax.random.PRNGKey(1), 1, 40, D)
    out2 = jax.block_until_ready(mhdpa_forward(*args2, num_heads=H, max_q_tile=16))
    ref2 = reference_forward(*args2, num_heads=H)
    assert out2.shape == (1, 40, D)
    err2 = float(jnp.max(jnp.abs(out2 - ref2)))
    assert jnp.allclose(out2, ref2, atol=2.5e-2, rtol=2.5e-2), f"max abs err {err2}"

    print("KERNEL_OK")
</pallas_src>

<mosaic_0001>
module attributes {stable_mosaic.version = 11 : i64} {
  func.func @mha_kernel(%arg0: i32, %arg1: i32, %arg2: memref<1x8x32xbf16, #tpu.memory_space<vmem>>, %arg3: memref<32x32xbf16, #tpu.memory_space<vmem>>, %arg4: memref<1x32xf32, #tpu.memory_space<vmem>>, %arg5: memref<32x32xbf16, #tpu.memory_space<vmem>>, %arg6: memref<1x32xf32, #tpu.memory_space<vmem>>, %arg7: memref<32x32xbf16, #tpu.memory_space<vmem>>, %arg8: memref<1x32xf32, #tpu.memory_space<vmem>>, %arg9: memref<32x32xbf16, #tpu.memory_space<vmem>>, %arg10: memref<1x32xf32, #tpu.memory_space<vmem>>, %arg11: memref<1x8x32xf32, #tpu.memory_space<vmem>>, %arg12: memref<4x8x8xbf16, #tpu.memory_space<vmem>>, %arg13: memref<4x8x8xbf16, #tpu.memory_space<vmem>>) attributes {dimension_semantics = [#tpu.dimension_semantics<parallel>, #tpu.dimension_semantics<arbitrary>], iteration_bounds = array<i64: 2, 1>, scalar_prefetch = 0 : i64, scratch_operands = 2 : i64, tpu.core_type = #tpu.core_type<tc>, window_params = [{transform_indices = @transform_0, window_bounds = array<i64: 1, 8, 32>}, {pipeline_mode = #tpu.pipeline_mode<synchronous>, transform_indices = @transform_1, window_bounds = array<i64: 32, 32>}, {pipeline_mode = #tpu.pipeline_mode<synchronous>, transform_indices = @transform_2, window_bounds = array<i64: 1, 32>}, {pipeline_mode = #tpu.pipeline_mode<synchronous>, transform_indices = @transform_3, window_bounds = array<i64: 32, 32>}, {pipeline_mode = #tpu.pipeline_mode<synchronous>, transform_indices = @transform_4, window_bounds = array<i64: 1, 32>}, {pipeline_mode = #tpu.pipeline_mode<synchronous>, transform_indices = @transform_5, window_bounds = array<i64: 32, 32>}, {pipeline_mode = #tpu.pipeline_mode<synchronous>, transform_indices = @transform_6, window_bounds = array<i64: 1, 32>}, {pipeline_mode = #tpu.pipeline_mode<synchronous>, transform_indices = @transform_7, window_bounds = array<i64: 32, 32>}, {pipeline_mode = #tpu.pipeline_mode<synchronous>, transform_indices = @transform_8, window_bounds = array<i64: 1, 32>}, {transform_indices = @transform_9, window_bounds = array<i64: 1, 8, 32>}]} {
    %c0_i32 = arith.constant 0 : i32
    %0 = arith.cmpi eq, %arg1, %c0_i32 : i32
    %1 = arith.extui %0 : i1 to i32
    %c0_i32_0 = arith.constant 0 : i32
    %2 = arith.cmpi ne, %1, %c0_i32_0 : i32
    scf.if %2 {
      %c0_24 = arith.constant 0 : index
      %c0_25 = arith.constant 0 : index
      %c0_26 = arith.constant 0 : index
      %42 = vector.load %arg2[%c0_24, %c0_25, %c0_26] : memref<1x8x32xbf16, #tpu.memory_space<vmem>>, vector<1x8x32xbf16>
      %43 = vector.shape_cast %42 : vector<1x8x32xbf16> to vector<8x32xbf16>
      %c0_27 = arith.constant 0 : index
      %c0_28 = arith.constant 0 : index
      %44 = vector.load %arg5[%c0_27, %c0_28] : memref<32x32xbf16, #tpu.memory_space<vmem>>, vector<32x32xbf16>
      %cst_29 = arith.constant dense<0.000000e+00> : vector<8x32xf32>
      %45 = tpu.matmul %43, %44, %cst_29 {dimension_numbers = #tpu.dot_dimension_numbers<[1], [0], [0], [1], [0, 0, 1, 1], [], []>} : vector<8x32xbf16>, vector<32x32xbf16>, vector<8x32xf32> -> vector<8x32xf32>
      %c0_30 = arith.constant 0 : index
      %c0_31 = arith.constant 0 : index
      %46 = vector.load %arg6[%c0_30, %c0_31] : memref<1x32xf32, #tpu.memory_space<vmem>>, vector<1x32xf32>
      %47 = vector.broadcast %46 : vector<1x32xf32> to vector<8x32xf32>
      %48 = arith.addf %45, %47 : vector<8x32xf32>
      %c0_32 = arith.constant 0 : index
      %c0_33 = arith.constant 0 : index
      %49 = vector.load %arg7[%c0_32, %c0_33] : memref<32x32xbf16, #tpu.memory_space<vmem>>, vector<32x32xbf16>
      %cst_34 = arith.constant dense<0.000000e+00> : vector<8x32xf32>
      %50 = tpu.matmul %43, %49, %cst_34 {dimension_numbers = #tpu.dot_dimension_numbers<[1], [0], [0], [1], [0, 0, 1, 1], [], []>} : vector<8x32xbf16>, vector<32x32xbf16>, vector<8x32xf32> -> vector<8x32xf32>
      %c0_35 = arith.constant 0 : index
      %c0_36 = arith.constant 0 : index
      %51 = vector.load %arg8[%c0_35, %c0_36] : memref<1x32xf32, #tpu.memory_space<vmem>>, vector<1x32xf32>
      %52 = vector.broadcast %51 : vector<1x32xf32> to vector<8x32xf32>
      %53 = arith.addf %50, %52 : vector<8x32xf32>
      %54 = vector.shape_cast %48 : vector<8x32xf32> to vector<8x4x8xf32>
      %55 = tpu.transpose %54, [1, 0, 2] : vector<8x4x8xf32> -> vector<4x8x8xf32>
      %56 = tpu.transpose %55, [0, 2, 1] : vector<4x8x8xf32> -> vector<4x8x8xf32>
      %57 = arith.truncf %56 : vector<4x8x8xf32> to vector<4x8x8xbf16>
      %c0_37 = arith.constant 0 : index
      %c0_38 = arith.constant 0 : index
      %c0_39 = arith.constant 0 : index
      %58 = vector.load %arg12[%c0_37, %c0_38, %c0_39] : memref<4x8x8xbf16, #tpu.memory_space<vmem>>, vector<4x8x8xbf16>
      tpu.vector_store %arg12[%c0_37, %c0_38, %c0_39], %57 {strides = array<i32>} : memref<4x8x8xbf16, #tpu.memory_space<vmem>>, vector<4x8x8xbf16>,
      %59 = vector.shape_cast %53 : vector<8x32xf32> to vector<8x4x8xf32>
      %60 = tpu.transpose %59, [1, 0, 2] : vector<8x4x8xf32> -> vector<4x8x8xf32>
      %61 = arith.truncf %60 : vector<4x8x8xf32> to vector<4x8x8xbf16>
      %c0_40 = arith.constant 0 : index
      %c0_41 = arith.constant 0 : index
      %c0_42 = arith.constant 0 : index
      %62 = vector.load %arg13[%c0_40, %c0_41, %c0_42] : memref<4x8x8xbf16, #tpu.memory_space<vmem>>, vector<4x8x8xbf16>
      tpu.vector_store %arg13[%c0_40, %c0_41, %c0_42], %61 {strides = array<i32>} : memref<4x8x8xbf16, #tpu.memory_space<vmem>>, vector<4x8x8xbf16>,
    } else {
    }
    %c8_i32 = arith.constant 8 : i32
    %3 = arith.muli %arg1, %c8_i32 : i32
    %4 = tpu.assume_multiple %3, 8 : i32
    %c0 = arith.constant 0 : index
    %5 = arith.index_cast %4 : i32 to index
    %c0_1 = arith.constant 0 : index
    %6 = vector.load %arg2[%c0, %5, %c0_1] : memref<1x8x32xbf16, #tpu.memory_space<vmem>>, vector<1x8x32xbf16>
    %7 = vector.shape_cast %6 : vector<1x8x32xbf16> to vector<8x32xbf16>
    %c0_2 = arith.constant 0 : index
    %c0_3 = arith.constant 0 : index
    %8 = vector.load %arg3[%c0_2, %c0_3] : memref<32x32xbf16, #tpu.memory_space<vmem>>, vector<32x32xbf16>
    %cst = arith.constant dense<0.000000e+00> : vector<8x32xf32>
    %9 = tpu.matmul %7, %8, %cst {dimension_numbers = #tpu.dot_dimension_numbers<[1], [0], [0], [1], [0, 0, 1, 1], [], []>} : vector<8x32xbf16>, vector<32x32xbf16>, vector<8x32xf32> -> vector<8x32xf32>
    %c0_4 = arith.constant 0 : index
    %c0_5 = arith.constant 0 : index
    %10 = vector.load %arg4[%c0_4, %c0_5] : memref<1x32xf32, #tpu.memory_space<vmem>>, vector<1x32xf32>
    %11 = vector.broadcast %10 : vector<1x32xf32> to vector<8x32xf32>
    %12 = arith.addf %9, %11 : vector<8x32xf32>
    %13 = vector.shape_cast %12 : vector<8x32xf32> to vector<8x4x8xf32>
    %14 = tpu.transpose %13, [1, 0, 2] : vector<8x4x8xf32> -> vector<4x8x8xf32>
    %15 = arith.truncf %14 : vector<4x8x8xf32> to vector<4x8x8xbf16>
    %c0_6 = arith.constant 0 : index
    %c0_7 = arith.constant 0 : index
    %c0_8 = arith.constant 0 : index
    %16 = vector.load %arg12[%c0_6, %c0_7, %c0_8] : memref<4x8x8xbf16, #tpu.memory_space<vmem>>, vector<4x8x8xbf16>
    "tpu.trace_start"() <{level = 10 : i32, message = "hqd,hds->hqs"}> : () -> ()
    %cst_9 = arith.constant dense<0.000000e+00> : vector<4x8x8xf32>
    %17 = tpu.matmul %15, %16, %cst_9 {dimension_numbers = #tpu.dot_dimension_numbers<[2], [1], [1], [2], [0, 0, 0, 1, 1, 2], [0], [0]>} : vector<4x8x8xbf16>, vector<4x8x8xbf16>, vector<4x8x8xf32> -> vector<4x8x8xf32>
    "tpu.trace_stop"() : () -> ()
    %cst_10 = arith.constant dense<0xFF800000> : vector<4x8xf32>
    %18 = vector.multi_reduction <maximumf>, %17, %cst_10 [2] : vector<4x8x8xf32> to vector<4x8xf32>
    %19 = vector.shape_cast %18 : vector<4x8xf32> to vector<4x8x1xf32>
    %20 = vector.broadcast %19 : vector<4x8x1xf32> to vector<4x8x8xf32>
    %21 = arith.subf %17, %20 : vector<4x8x8xf32>
    %22 = math.exp %21 : vector<4x8x8xf32>
    %cst_11 = arith.constant dense<0.000000e+00> : vector<4x8xf32>
    %23 = vector.multi_reduction <add>, %22, %cst_11 [2] : vector<4x8x8xf32> to vector<4x8xf32>
    %24 = vector.shape_cast %23 : vector<4x8xf32> to vector<4x8x1xf32>
    %25 = tpu.reciprocal %24 {approx = true} : vector<4x8x1xf32> -> vector<4x8x1xf32>
    %26 = vector.broadcast %25 : vector<4x8x1xf32> to vector<4x8x8xf32>
    %27 = arith.mulf %22, %26 : vector<4x8x8xf32>
    %28 = arith.truncf %27 : vector<4x8x8xf32> to vector<4x8x8xbf16>
    %c0_12 = arith.constant 0 : index
    %c0_13 = arith.constant 0 : index
    %c0_14 = arith.constant 0 : index
    %29 = vector.load %arg13[%c0_12, %c0_13, %c0_14] : memref<4x8x8xbf16, #tpu.memory_space<vmem>>, vector<4x8x8xbf16>
    "tpu.trace_start"() <{level = 10 : i32, message = "hqk,hkd->hqd"}> : () -> ()
    %cst_15 = arith.constant dense<0.000000e+00> : vector<4x8x8xf32>
    %30 = tpu.matmul %28, %29, %cst_15 {dimension_numbers = #tpu.dot_dimension_numbers<[2], [1], [1], [2], [0, 0, 0, 1, 1, 2], [0], [0]>} : vector<4x8x8xbf16>, vector<4x8x8xbf16>, vector<4x8x8xf32> -> vector<4x8x8xf32>
    "tpu.trace_stop"() : () -> ()
    %31 = tpu.transpose %30, [1, 0, 2] : vector<4x8x8xf32> -> vector<8x4x8xf32>
    %32 = vector.shape_cast %31 : vector<8x4x8xf32> to vector<8x32xf32>
    %33 = arith.truncf %32 : vector<8x32xf32> to vector<8x32xbf16>
    %c0_16 = arith.constant 0 : index
    %c0_17 = arith.constant 0 : index
    %34 = vector.load %arg9[%c0_16, %c0_17] : memref<32x32xbf16, #tpu.memory_space<vmem>>, vector<32x32xbf16>
    %cst_18 = arith.constant dense<0.000000e+00> : vector<8x32xf32>
    %35 = tpu.matmul %33, %34, %cst_18 {dimension_numbers = #tpu.dot_dimension_numbers<[1], [0], [0], [1], [0, 0, 1, 1], [], []>} : vector<8x32xbf16>, vector<32x32xbf16>, vector<8x32xf32> -> vector<8x32xf32>
    %c0_19 = arith.constant 0 : index
    %c0_20 = arith.constant 0 : index
    %36 = vector.load %arg10[%c0_19, %c0_20] : memref<1x32xf32, #tpu.memory_space<vmem>>, vector<1x32xf32>
    %37 = vector.broadcast %36 : vector<1x32xf32> to vector<8x32xf32>
    %38 = arith.addf %35, %37 : vector<8x32xf32>
    %c0_21 = arith.constant 0 : index
    %c0_22 = arith.constant 0 : index
    %c0_23 = arith.constant 0 : index
    %39 = vector.load %arg11[%c0_21, %c0_22, %c0_23] : memref<1x8x32xf32, #tpu.memory_space<vmem>>, vector<1x8x32xf32>
    %40 = vector.shape_cast %39 : vector<1x8x32xf32> to vector<8x32xf32>
    %41 = vector.shape_cast %38 : vector<8x32xf32> to vector<1x8x32xf32>
    tpu.vector_store %arg11[%c0_21, %c0_22, %c0_23], %41 {strides = array<i32>} : memref<1x8x32xf32, #tpu.memory_space<vmem>>, vector<1x8x32xf32>,
    return
  }
  func.func @transform_0(%arg0: i32, %arg1: i32) -> (i32, i32, i32) {
    %c0_i32 = arith.constant 0 : i32
    %c0_i32_0 = arith.constant 0 : i32
    %c0_i32_1 = arith.constant 0 : i32
    return %arg0, %c0_i32, %c0_i32_0 : i32, i32, i32
  }
  func.func @transform_1(%arg0: i32, %arg1: i32) -> (i32, i32) {
    %c0_i32 = arith.constant 0 : i32
    %c0_i32_0 = arith.constant 0 : i32
    %c0_i32_1 = arith.constant 0 : i32
    return %c0_i32, %c0_i32_0 : i32, i32
  }
  func.func @transform_2(%arg0: i32, %arg1: i32) -> (i32, i32) {
    %c0_i32 = arith.constant 0 : i32
    %c0_i32_0 = arith.constant 0 : i32
    %c0_i32_1 = arith.constant 0 : i32
    return %c0_i32, %c0_i32_0 : i32, i32
  }
  func.func @transform_3(%arg0: i32, %arg1: i32) -> (i32, i32) {
    %c0_i32 = arith.constant 0 : i32
    %c0_i32_0 = arith.constant 0 : i32
    %c0_i32_1 = arith.constant 0 : i32
    return %c0_i32, %c0_i32_0 : i32, i32
  }
  func.func @transform_4(%arg0: i32, %arg1: i32) -> (i32, i32) {
    %c0_i32 = arith.constant 0 : i32
    %c0_i32_0 = arith.constant 0 : i32
    %c0_i32_1 = arith.constant 0 : i32
    return %c0_i32, %c0_i32_0 : i32, i32
  }
  func.func @transform_5(%arg0: i32, %arg1: i32) -> (i32, i32) {
    %c0_i32 = arith.constant 0 : i32
    %c0_i32_0 = arith.constant 0 : i32
    %c0_i32_1 = arith.constant 0 : i32
    return %c0_i32, %c0_i32_0 : i32, i32
  }
  func.func @transform_6(%arg0: i32, %arg1: i32) -> (i32, i32) {
    %c0_i32 = arith.constant 0 : i32
    %c0_i32_0 = arith.constant 0 : i32
    %c0_i32_1 = arith.constant 0 : i32
    return %c0_i32, %c0_i32_0 : i32, i32
  }
  func.func @transform_7(%arg0: i32, %arg1: i32) -> (i32, i32) {
    %c0_i32 = arith.constant 0 : i32
    %c0_i32_0 = arith.constant 0 : i32
    %c0_i32_1 = arith.constant 0 : i32
    return %c0_i32, %c0_i32_0 : i32, i32
  }
  func.func @transform_8(%arg0: i32, %arg1: i32) -> (i32, i32) {
    %c0_i32 = arith.constant 0 : i32
    %c0_i32_0 = arith.constant 0 : i32
    %c0_i32_1 = arith.constant 0 : i32
    return %c0_i32, %c0_i32_0 : i32, i32
  }
  func.func @transform_9(%arg0: i32, %arg1: i32) -> (i32, i32, i32) {
    %c0_i32 = arith.constant 0 : i32
    %c0_i32_0 = arith.constant 0 : i32
    return %arg0, %arg1, %c0_i32 : i32, i32, i32
  }
}

</mosaic_0001>

<bundles_post_ra>
// kernel: tpu_custom_call.1
= control target key start
LH: loop header
LB: loop body
LE: loop exit
PB: predicated region body
PF: predicated region fallthrough
CT: control target
= control target key end

     0   :  { %s3012_s0 = inlined_call_operand.hbm [shape: bf16[2,8,32], index: 0, kind: input, shape index: {}]   ;;  %s3013_s1 = inlined_call_operand.hbm [shape: bf16[32,32], index: 1, kind: input, shape index: {}]   ;;  %s3014_s2 = inlined_call_operand.vmem [shape: f32[1,32], index: 2, kind: input, shape index: {}]   ;;  %s3015_s3 = inlined_call_operand.hbm [shape: bf16[32,32], index: 3, kind: input, shape index: {}]   ;;  %s3016_s4 = inlined_call_operand.vmem [shape: f32[1,32], index: 4, kind: input, shape index: {}]   ;;  %s3017_s5 = inlined_call_operand.hbm [shape: bf16[32,32], index: 5, kind: input, shape index: {}]   ;;  %s3018_s6 = inlined_call_operand.vmem [shape: f32[1,32], index: 6, kind: input, shape index: {}]   ;;  %s3019_s7 = inlined_call_operand.hbm [shape: bf16[32,32], index: 7, kind: input, shape index: {}]   ;;  %s3020_s8 = inlined_call_operand.vmem [shape: f32[1,32], index: 8, kind: input, shape index: {}]   ;;  %s3021_s9 = inlined_call_operand.hbm [shape: f32[2,8,32], index: 9, kind: output, shape index: {}]  }
   0x1   :  { %3024 = sst [smem:[#allocation20_spill]] %s3013_s1 }
   0x2   :  { %3025 = sst [smem:[#allocation21_spill]] %s3015_s3 }
   0x3   :  { %3026 = sst [smem:[#allocation22_spill]] %s3017_s5 }
   0x4   :  { %3027 = sst [smem:[#allocation23_spill]] %s3019_s7 }
   0x5   :  { %14 = vsyncpa [#allocation5], 0 }
   0x6   :  { %16 = vsyncpa [#allocation5 + $0x1], 0 }
   0x7   :  { %17 = vsyncpa [#allocation8], 0 }
   0x8   :  { %18 = vsyncpa [#allocation11], 0 }
   0x9   :  { %19 = vsyncpa [#allocation6], 0 }
   0xa   :  { %21 = vsyncpa [#allocation6 + $0x1], 0  ;;  %s2601_s30 = smov 0   ;;  %s2603_s10 = smov 0  }
   0xb   :  { %s2605_s11 = smov 0   ;;  %s2607_s12 = smov 0  }
   0xc   :  { %s2609_s13 = smov 0   ;;  %s2611_s14 = smov 0  }
   0xd LB: > { %3028 = sst [smem:[#allocation18_spill]] %s2527_s13  ;;  %s1997_s15 = sadd.s32 4294967295, %s2531_s14   ;;  %s2531_s14 = sphi %s2611_s14, %s27_s14   ;;  %s2527_s13 = sphi %s2609_s13, %s3045_s13   ;;  %s2523_s12 = sphi %s2607_s12, %s3044_s12   ;;  %s2519_s11 = sphi %s2605_s11, %s3048_s11   ;;  %s2515_s10 = sphi %s2603_s10, %s3047_s10   ;;  %s2511_s30 = sphi %s2601_s30, %s3046_s30  }
   0xe   : > { %p1999_p0 = scmp.ge.s32.totalorder %s2531_s14, 1  ;;  %p2635_p1 = scmp.eq.s32.totalorder %s1997_s15, 0 }
   0xf   : > { %p266_p2 = scmp.lt.s32.totalorder %s2531_s14, 3  ;;  %s2533_s18 = smov [#allocation7]  }
  0x10   : > { %s278_s19 = sshll.u32 %s2533_s18, 4  ;;  %s2534_s21 = smov [#allocation10]   ;;  %s279_s19 = int_to_ptr.vmem [resolvable:$true] %s278_s19 }
  0x11   : > { %p2640_p3 = pnand %p1999_p0, %p266_p2  ;;  %s310_s22 = sshll.u32 %s2534_s21, 4  ;;  %s311_s22 = int_to_ptr.vmem [resolvable:$true] %s310_s22 }
  0x12   : > { %s2535_s23 = smov [#allocation9]   ;;  %s2322_s25 = scalar_lea.vmem %s279_s19, 256 }
  0x13   : > { %p2178_p4 = pneg %p2640_p3  ;;  %s294_s24 = sshll.u32 %s2535_s23, 4  ;;  %s295_s24 = int_to_ptr.vmem [resolvable:$true] %s294_s24 }
  0x14   : > { %p2323_p8 = scmp.ne.s32.totalorder %s279_s19, %s2322_s25  ;;  %p2330_p11 = scmp.lt.s32.totalorder %s279_s19, %s279_s19 }
  0x15   : > { %p2649_p6 = pnand %p2178_p4, %p2635_p1  ;;  %p2331_p12 = scmp.lt.s32.totalorder %s2322_s25, %s2322_s25 }
  0x17   : > { %p2313_p7 = pneg %p2649_p6  ;;  %p2332_p13 = por %p2331_p12, %p2330_p11 }
  0x19   : > { %p2325_p9 = pnand %p2323_p8, %p2313_p7 }
  0x1b   : > { %p2326_p10 = pneg %p2325_p9 }
  0x1d   : > { %p2333_p0 = pnand %p2332_p13, %p2326_p10 }
  0x1f   : > { %2336 = shalt.err (!%p2333_p0)
}
  0x20   : > { %s2536_s26 = smov 64   ;;  %s2537_s27 = smov 4  }
  0x21   : > { %s3032_s1 = sld [smem:[#allocation20_spill]]  ;;  %s2348_s18 = scalar_lea.vmem %s311_s22, 256 }
  0x22   : > { %p2349_p2 = scmp.ne.s32.totalorder %s311_s22, %s2348_s18  ;;  %p2356_p9 = scmp.lt.s32.totalorder %s311_s22, %s311_s22 }
  0x23   : > { %p2357_p10 = scmp.lt.s32.totalorder %s2348_s18, %s2348_s18 }
  0x24   : > { %p2351_p4 = pnand %p2349_p2, %p2313_p7 }
  0x25   : > { %p2358_p11 = por %p2357_p10, %p2356_p9 }
  0x26   : > { %p2352_p8 = pneg %p2351_p4 }
  0x27   : > { %2181 = dma.hbm_to_vmem [thread:$0]  (!%p2649_p6), %s3032_s1, 256, %s279_s19, [#allocation8], %s2536_s26, %s2536_s26, %s2537_s27  }
  0x28   : > { %p2359_p12 = pnand %p2358_p11, %p2352_p8 }
  0x2a   : > { %2362 = shalt.err (!%p2359_p12)
}
  0x2b   : > { %s3033_s5 = sld [smem:[#allocation22_spill]]  ;;  %s2374_s19 = scalar_lea.vmem %s295_s24, 256 }
  0x2c   : > { %p2375_p13 = scmp.ne.s32.totalorder %s295_s24, %s2374_s19  ;;  %p2382_p4 = scmp.lt.s32.totalorder %s295_s24, %s295_s24 }
  0x2d   : > { %p2383_p8 = scmp.lt.s32.totalorder %s2374_s19, %s2374_s19 }
  0x2e   : > { %p2377_p0 = pnand %p2375_p13, %p2313_p7 }
  0x2f   : > { %p2384_p9 = por %p2383_p8, %p2382_p4 }
  0x30   : > { %p2378_p2 = pneg %p2377_p0 }
  0x31   : > { %2187 = dma.hbm_to_vmem [thread:$0]  (!%p2649_p6), %s3033_s5, 256, %s311_s22, [#allocation11], %s2536_s26, %s2536_s26, %s2537_s27  }
  0x32   : > { %p2385_p10 = pnand %p2384_p9, %p2378_p2 }
  0x34   : > { %2388 = shalt.err (!%p2385_p10)
}
  0x35   : > { %s3034_s3 = sld [smem:[#allocation21_spill]]  ;;  %s2538_s22 = smov [#allocation12]  }
  0x36   : > { %s326_s29 = sshll.u32 %s2538_s22, 4  ;;  %s327_s29 = int_to_ptr.vmem [resolvable:$true] %s326_s29 }
  0x37   : > { %s2400_s18 = scalar_lea.vmem %s327_s29, 256  ;;  %p2408_p0 = scmp.lt.s32.totalorder %s327_s29, %s327_s29 }
  0x38   : > { %p2401_p11 = scmp.ne.s32.totalorder %s327_s29, %s2400_s18  ;;  %p2409_p2 = scmp.lt.s32.totalorder %s2400_s18, %s2400_s18 }
  0x3a   : > { %p2403_p12 = pnand %p2401_p11, %p2313_p7  ;;  %p2410_p4 = por %p2409_p2, %p2408_p0 }
  0x3b   : > { %2184 = dma.hbm_to_vmem [thread:$0]  (!%p2649_p6), %s3034_s3, 256, %s295_s24, [#allocation8], %s2536_s26, %s2536_s26, %s2537_s27  }
  0x3c   : > { %p2404_p13 = pneg %p2403_p12 }
  0x3e   : > { %p2411_p8 = pnand %p2410_p4, %p2404_p13 }
  0x40   : > { %2414 = shalt.err (!%p2411_p8)
}
  0x41   : > { %s3035_s7 = sld [smem:[#allocation23_spill]]  ;;  %s1998_s20 = sadd.s32 4294967294, %s2531_s14  }
  0x42   : > { %s39_s23 = sadd.s32 1, %s2527_s13  ;;  %s46_s19 = sadd.s32 1, %s2519_s11 }
  0x43   : > { %p41_p7 = scmp.ge.s32.totalorder %s39_s23, 2  ;;  %p53_p9 = scmp.ne.s32.totalorder %s2519_s11, %s2515_s10 }
  0x44   : > { %p54_p10 = scmp.eq.s32.totalorder %s2531_s14, 0  ;;  %p59_p12 = scmp.ne.s32.totalorder %s2515_s10, %s2511_s30 }
  0x45   : > { %s3050_s23 = smov (%p41_p7, %s39_s23), 0  ;;  %p259_p4 = scmp.eq.s32.totalorder %s1998_s20, 1 }
  0x46   : > { %3036 = sst [smem:[#allocation19_spill]] %s3050_s23  ;;  %p2707_p11 = por %p54_p10, %p53_p9 }
  0x47   : > { %2190 = dma.hbm_to_vmem [thread:$0]  (!%p2649_p6), %s3035_s7, 256, %s327_s29, [#allocation11], %s2536_s26, %s2536_s26, %s2537_s27  }
  0x48   : > { %s43_s26 = ssub.s32 %s2527_s13, %s3050_s23  ;;  %p253_p6 = scmp.eq.s32.totalorder %s1997_s15, 1 }
  0x49   : > { %p44_p13 = scmp.eq.s32.totalorder %s43_s26, 0  ;;  %p2719_p0 = por %p2635_p1, %p59_p12 }
  0x4a   : > { %p2723_p2 = por %p253_p6, %p53_p9  ;;  %p2730_p8 = por %p259_p4, %p59_p12 }
  0x4b   : > { %s2728_s22 = scalar_select %p44_p13, %s2519_s11, %s46_s19  }
  0x4c   : > { %s3040_s29 = scalar_select %p2730_p8, 1, 0 }
  0x4d   : > { %p2203_p7 = scmp.lt.s32.totalorder %s2531_s14, 2  ;;  %s343_s18 = sand.u32 1, %s2519_s11  }
  0x4e   : > { %s2006_s15 = sshll.u32 %s2527_s13, 6  ;;  %s2005_s24 = sshll.u32 %s343_s18, 2 }
  0x4f   : > { %s352_s1 = scalar_lea.hbm %s3012_s0, %s2006_s15  ;;  %s347_s3 = scalar_lea.vmem [#allocation4], %s2005_s24 }
  0x50   : > { %s354_s5 = sshll.u32 %s347_s3, 4  ;;  %p2742_p9 = pnand %p2203_p7, %p2707_p11  ;;  %s355_s5 = int_to_ptr.vmem [resolvable:$true] %s354_s5 }
  0x51   : > { %s344_s20 = scalar_lea.sflag [#allocation5], %s343_s18  ;;  %s2428_s19 = scalar_lea.vmem %s355_s5, 64 }
  0x52   : > { %p2417_p10 = pneg %p2742_p9  ;;  %p2429_p12 = scmp.ne.s32.totalorder %s355_s5, %s2428_s19 }
  0x53   : > { %s2539_s23 = smov [#allocation4]  }
  0x54   : > { %p2431_p6 = pnand %p2429_p12, %p2417_p10  ;;  %s2433_s13 = sshll.u32 %s2539_s23, 4  ;;  %s2434_s13 = int_to_ptr.vmem [resolvable:$false] %s2433_s13 }
  0x55   : > { %s2435_s15 = scalar_lea.vmem %s2434_s13, 128  ;;  %p2436_p4 = scmp.lt.s32.totalorder %s355_s5, %s2434_s13 }
  0x56   : > { %p2432_p13 = pneg %p2431_p6  ;;  %p2437_p5 = scmp.lt.s32.totalorder %s2435_s15, %s2428_s19 }
  0x58   : > { %p2438_p8 = por %p2437_p5, %p2436_p4 }
  0x5a   : > { %p2439_p11 = pnand %p2438_p8, %p2432_p13 }
  0x5c   : > { %2442 = shalt.err (!%p2439_p11)
}
  0x5d   : > { %2194 = dma.hbm_to_vmem [thread:$0]  (!%p2742_p9), %s352_s1, 64, %s355_s5, %s344_s20  }
  0x5e   : > { %363 = sbr.rel (%p2640_p3) target bundleno = 1651 (0x673), region = 56  ;;  %s2753_s3 = sand.u32 (!%p2640_p3), 1, %s2515_s10  }
  0x5f   : > { %s2008_s23 = sshll.u32 (!%p2640_p3), %s2753_s3, 2  ;;  %s366_s25 = scalar_lea.sflag (!%p2640_p3), [#allocation5], %s2753_s3 }
  0x60   : > { %s369_s18 = scalar_lea.vmem (!%p2640_p3), [#allocation4], %s2008_s23 }
  0x63   : > { %2494 = dma.done.wait (%p2719_p0), %s366_s25, 64  }
  0x64   : > { %2496 = vsyncadd (%p2719_p0), %s366_s25, 4294967232 }
  0x65   : > { %2498 = dma.done.wait (%p2635_p1), [#allocation8], 512  }
  0x66   : > { %2500 = vsyncadd (%p2635_p1), [#allocation8], 4294966784 }
  0x67   : > { %2502 = dma.done.wait (%p2635_p1), [#allocation11], 512  }
  0x68   : > { %2504 = vsyncadd (%p2635_p1), [#allocation11], 4294966784  ;;  %v2540_v0 = vmov 0.0   ;;  %vm2541_vm0 = vmmov 0   ;;  %v2287_v1 = vld [vmem:[#allocation9 + $0x8] sm:$0xff]   ;;  %v2288_v2 = vld [vmem:[#allocation9] sm:$0xff]   ;;  %v571_v21 = vlaneseq }
  0x69   : > { %2078 = vmatprep.subr.bf16.mxu0 %v2540_v0  ;;  %2082 = vmatprep.mubr.msk.bf16.mxu0 %vm2541_vm0, %v2540_v0  ;;  %v2776_v3 = vld [vmem:[%s369_s18] sm:$0xf]  ;;  %vm449_vm1 = vcmask 261120   ;;  %v2289_v4 = vld [vmem:[#allocation7 + $0x8] sm:$0xff]   ;;  %v2290_v5 = vld [vmem:[#allocation7] sm:$0xff]   ;;  %s2542_s7 = smov 104  }
  0x6a   : > { %2086 = vmatprep.subr.bf16.mxu1 %v2540_v0  ;;  %2090 = vmatprep.mubr.msk.bf16.mxu1 %vm2541_vm0, %v2540_v0  ;;  %v998_v6 = vld [vmem:[%s369_s18] sm:$0xf]  ;;  %s2543_s13 = smov 120   ;;  %s2544_s27 = smov 112   ;;  %v2545_v19 = vmov 1983009808  }
  0x6b   : > { %2079 = vmatpush3.bf16.msra.mxu0 %v2287_v1  ;;  %v2014_v7 = vld [vmem:[%s3016_s4] ss:$0 sm:$0xff]  ;;  %v569_v20 = vunpack.c.l.s4 %v2545_v19  ;;  %v2546_v22 = vmov 1934713408   ;;  %v572_v25 = vshrl.u32 %v571_v21, 7  ;;  %v2291_v56 = vld [vmem:[#allocation10 + $0x8] sm:$0xff]  }
  0x6c   : > { %2080 = vmatprep.subr.bf16.mxu0 %v2540_v0  ;;  %v2026_v13 = vld [vmem:[%s3014_s2] ss:$0 sm:$0xff]  ;;  %v601_v23 = vunpack.c.l.s4 %v2546_v22  ;;  %2087 = vmatpush3.bf16.msra.mxu1 %v2291_v56  ;;  %vm834_vm2 = vcmask 60416   ;;  %vm1224_vm3 = vcmask 1043456   ;;  %vm1220_vm4 = vcmask 64512   ;;  %s2547_s26 = smov 16  }
  0x6d   : > { %v570_v24 = vunpack.c.0.s8 %v569_v20  ;;  %2088 = vmatprep.subr.bf16.mxu1 %v2540_v0  ;;  %s2548_s20 = smov 8   ;;  %s2549_s19 = smov 24   ;;  %vm1791_vm5 = vcmask 130048   ;;  %vm1793_vm6 = vcmask 195584  }
  0x6e   : > { %v602_v28 = vunpack.c.0.s8 %v601_v23  ;;  %s2013_s15 = sshll.u32 %s2753_s3, 3  ;;  %s2047_s18 = sshll.u32 %s2523_s12, 7 }
  0x6f   : > { %2081 = vmatpush3.bf16.msra.mxu0 %v2288_v2  ;;  %v2805_v29 = vsub.s32 %v570_v24, %v572_v25  ;;  %v2292_v2 = vld [vmem:[#allocation10] sm:$0xff]   ;;  %s419_s1 = scalar_lea.vmem [#allocation13], %s2013_s15  ;;  %s2963_s16 = scalar_lea.hbm %s3021_s9, %s2047_s18 }
  0x70   : > { %2094 = vmatprep.subr.bf16.mxu0 %v2540_v0  ;;  %v2807_v35 = vsub.s32 %v602_v28, %v572_v25  ;;  %2089 = vmatpush3.bf16.msra.mxu1 %v2292_v2  ;;  %s1878_s5 = sshll.u32 %s419_s1, 4  ;;  %s1864_s17 = scalar_lea.sflag [#allocation6], %s2753_s3  ;;  %s2965_s5 = int_to_ptr.vmem [resolvable:$true] %s1878_s5 }
  0x71   : > { %2102 = vmatprep.subr.bf16.mxu1 %v2540_v0  ;;  %s2443_s12 = scalar_lea.vmem %s2965_s5, 128 }
  0x72   : > { %2083 = vmatmul.mubr.msk.bf16.vlgmr.msra.gmra.mxu0 %vm449_vm1, %v2776_v3  ;;  %p2444_p1 = scmp.ne.s32.totalorder %s2965_s5, %s2443_s12 }
  0x73   : > { %2095 = vmatpush3.bf16.msra.mxu0 %v2289_v4  ;;  %2098 = vmatprep.mubr.msk.bf16.mxu0 %vm2541_vm0, %v2540_v0 }
  0x74   : > { %2096 = vmatprep.subr.bf16.mxu0 %v2540_v0  ;;  %2091 = vmatmul.mubr.msk.bf16.vlgmr.msra.gmra.mxu1 %vm449_vm1, %v2776_v3  ;;  %p2445_p3 = pnand %p2444_p1, %p2723_p2 }
  0x75   : > { %2104 = vmatprep.mubr.msk.bf16.mxu1 %vm2541_vm0, %v2540_v0 }
  0x76   : > { %p2446_p5 = pneg %p2445_p3 }
  0x77   : > { %2097 = vmatpush3.bf16.msra.mxu0 %v2290_v5 }
  0x78   : > { %2108 = vmatprep.subr.bf16.mxu0 %v2540_v0 }
  0x7a   : > { %2099 = vmatmul.mubr.msk.bf16.vlgmr.msra.gmra.mxu0 %vm449_vm1, %v998_v6 }
  0x7b   : > { %2110 = vmatprep.mubr.msk.bf16.mxu0 %vm2541_vm0, %v2540_v0 }
 0x132   : > { %v487_v8 = vpop.f32.mrf.mxu0 }
 0x133   : > { %v488_v9 = vadd.f32 %v2014_v7, %v487_v8 }
 0x134   : > { %v2084_v10 = vpop.f32.mrf.mxu0 }
 0x135   : > { %563 = vrot.lane.b32.xlu1 %v488_v9, %s2542_s7  ;;  %557 = vrot.lane.b32.xlu0 %v488_v9, %s2543_s13 }
 0x136   : > { %v490_v11 = vpop.f32.mrf.mxu0 }
 0x138   : > { %v2085_v12 = vpop.f32.mrf.mxu0 }
 0x139   : > { %560 = vrot.lane.b32.xlu0 %v488_v9, %s2544_s27 }
 0x13a   : > { %v1060_v14 = vpop.f32.mrf.mxu0 }
 0x13b   : > { %v2797_v15 = vadd.f32 %v2026_v13, %v1060_v14 }
 0x13c   : > { %v2100_v16 = vpop.f32.mrf.mxu0 }
 0x13d   : > { %1070 = vrot.lane.b32.xlu0 %v2797_v15, %s2544_s27  ;;  %1067 = vrot.lane.b32.xlu1 %v2797_v15, %s2543_s13 }
 0x13e   : > { %v1063_v17 = vpop.f32.mrf.mxu0 }
 0x140   : > { %v2101_v18 = vpop.f32.mrf.mxu0 }
 0x141   : > { %1073 = vrot.lane.b32.xlu1 %v2797_v15, %s2542_s7 }
 0x1a7   : > { %v564_v26 = vpop.permute.xlu1 %563  ;;  %v558_v27 = vpop.permute.xlu0 %557 }
 0x1a8   : > { %v582_v30 = vcombine.low %v558_v27, %v564_v26  ;;  %v583_v31 = vcombine.high %v558_v27, %v564_v26 }
 0x1aa   : > { %v590_v36 = vrot.slane %v582_v30, %v2805_v29  ;;  %v597_v37 = vrot.slane %v583_v31, %v2805_v29 }
 0x1ab   : > { %v561_v32 = vpop.permute.xlu0 %560 }
 0x1ac   : > { %v566_v33 = vcombine.low %v488_v9, %v561_v32  ;;  %v567_v34 = vcombine.high %v488_v9, %v561_v32 }
 0x1ae   : > { %v574_v38 = vrot.slane %v566_v33, %v2805_v29  ;;  %v581_v39 = vrot.slane %v567_v34, %v2805_v29 }
 0x1af   : > { %v1068_v10 = vpop.permute.xlu1 %1067  ;;  %v1071_v12 = vpop.permute.xlu0 %1070 }
 0x1b0   : > { %v598_v40 = vcombine.low %v574_v38, %v590_v36  ;;  %v599_v41 = vcombine.high %v574_v38, %v590_v36  ;;  %v614_v42 = vcombine.low %v581_v39, %v597_v37  ;;  %v615_v43 = vcombine.high %v581_v39, %v597_v37 }
 0x1b1   : > { %v1076_v16 = vcombine.low %v2797_v15, %v1071_v12  ;;  %v1077_v17 = vcombine.high %v2797_v15, %v1071_v12 }
 0x1b2   : > { %v606_v44 = vrot.slane %v598_v40, %v2807_v35  ;;  %v613_v45 = vrot.slane %v599_v41, %v2807_v35  ;;  %v622_v46 = vrot.slane %v614_v42, %v2807_v35  ;;  %v629_v47 = vrot.slane %v615_v43, %v2807_v35 }
 0x1b3   : > { %v1074_v11 = vpop.permute.xlu1 %1073  ;;  %v1084_v20 = vrot.slane %v1076_v16, %v2805_v29  ;;  %v1091_v3 = vrot.slane %v1077_v17, %v2805_v29 }
 0x1b4   : > { %v634_v48 = vcombine.low %v606_v44, %v613_v45  ;;  %v2022_v49 = vcombine.high %v606_v44, %v613_v45  ;;  %v650_v50 = vcombine.low %v622_v46, %v629_v47  ;;  %v2023_v51 = vcombine.high %v622_v46, %v629_v47 }
 0x1b5   : > { %v1092_v13 = vcombine.low %v1068_v10, %v1074_v11  ;;  %v1093_v14 = vcombine.high %v1068_v10, %v1074_v11  ;;  %v550_v10 = vpop.f32.mrf.mxu1 }
 0x1b6   : > { %v641_v52 = vrot.slane %v634_v48, %v2805_v29  ;;  %v649_v53 = vrot.slane %v2022_v49, %v2805_v29  ;;  %v657_v54 = vrot.slane %v650_v50, %v2805_v29  ;;  %v665_v55 = vrot.slane %v2023_v51, %v2805_v29 }
 0x1b7   : > { %v1100_v18 = vrot.slane %v1092_v13, %v2805_v29  ;;  %v1107_v19 = vrot.slane %v1093_v14, %v2805_v29  ;;  %v2092_v11 = vpop.f32.mrf.mxu1 }
 0x1b8   : > { %v666_v57 = vcombine.low %v641_v52, %v649_v53  ;;  %v682_v58 = vcombine.low %v657_v54, %v665_v55  ;;  %v667_v59 = vcombine.high %v641_v52, %v649_v53  ;;  %v683_v60 = vcombine.high %v657_v54, %v665_v55 }
 0x1b9   : > { %v1108_v21 = vcombine.low %v1084_v20, %v1100_v18  ;;  %v1109_v22 = vcombine.high %v1084_v20, %v1100_v18  ;;  %v1124_v23 = vcombine.low %v1091_v3, %v1107_v19  ;;  %v1125_v24 = vcombine.high %v1091_v3, %v1107_v19  ;;  %v553_v12 = vpop.f32.mrf.mxu1 }
 0x1ba   : > { %v674_v61 = vrot.slane %v666_v57, %v2807_v35  ;;  %v690_v62 = vrot.slane %v682_v58, %v2807_v35  ;;  %v681_v63 = vrot.slane %v667_v59, %v2807_v35  ;;  %v697_v1 = vrot.slane %v683_v60, %v2807_v35 }
 0x1bb   : > { %v1116_v25 = vrot.slane %v1108_v21, %v2807_v35  ;;  %v1123_v26 = vrot.slane %v1109_v22, %v2807_v35  ;;  %v1132_v27 = vrot.slane %v1124_v23, %v2807_v35  ;;  %v1139_v15 = vrot.slane %v1125_v24, %v2807_v35  ;;  %v2093_v13 = vpop.f32.mrf.mxu1 }
 0x1bc   : > { %v698_v4 = vcombine.low %v674_v61, %v690_v62  ;;  %v699_v5 = vcombine.high %v674_v61, %v690_v62  ;;  %v700_v6 = vcombine.low %v681_v63, %v697_v1  ;;  %v701_v7 = vcombine.high %v681_v63, %v697_v1 }
 0x1bd   : > { %v1144_v28 = vcombine.low %v1116_v25, %v1123_v26  ;;  %v2030_v30 = vcombine.high %v1116_v25, %v1123_v26  ;;  %v1160_v31 = vcombine.low %v1132_v27, %v1139_v15  ;;  %v2031_v32 = vcombine.high %v1132_v27, %v1139_v15 }
 0x1be   : > { %v2273_v8 = vpack.i.bf16 %v699_v5, %v698_v4  ;;  %v2280_v9 = vpack.i.bf16 %v701_v7, %v700_v6 }
 0x1bf   : > { %v1151_v33 = vrot.slane %v1144_v28, %v2805_v29  ;;  %v1159_v34 = vrot.slane %v2030_v30, %v2805_v29  ;;  %v1167_v36 = vrot.slane %v1160_v31, %v2805_v29  ;;  %v1175_v37 = vrot.slane %v2031_v32, %v2805_v29  ;;  %v2018_v32 = vld [vmem:[%s3018_s6] ss:$0 sm:$0xff] }
 0x1c0   : > { %2274 = vxpose.xlu0.b32.start.end [1/1] (short) (narrow) %v2273_v8, 8  ;;  %2281 = vxpose.xlu1.b32.start.end [1/1] (short) (narrow) %v2280_v9, 8 }
 0x1c1   : > { %v1176_v44 = vcombine.low %v1151_v33, %v1159_v34  ;;  %v1192_v45 = vcombine.low %v1167_v36, %v1175_v37  ;;  %v1177_v52 = vcombine.high %v1151_v33, %v1159_v34  ;;  %v1193_v53 = vcombine.high %v1167_v36, %v1175_v37 }
 0x1c2   : > { %v551_v36 = vadd.f32 %v2018_v32, %v550_v10 }
 0x1c3   : > { %v1184_v50 = vrot.slane %v1176_v44, %v2807_v35  ;;  %v1200_v51 = vrot.slane %v1192_v45, %v2807_v35  ;;  %v1191_v62 = vrot.slane %v1177_v52, %v2807_v35  ;;  %v1207_v63 = vrot.slane %v1193_v53, %v2807_v35 }
 0x1c5   : > { %v1208_v54 = vcombine.low %v1184_v50, %v1200_v51  ;;  %v1209_v55 = vcombine.high %v1184_v50, %v1200_v51  ;;  %v1210_v6 = vcombine.low %v1191_v62, %v1207_v63  ;;  %v1211_v7 = vcombine.high %v1191_v62, %v1207_v63 }
 0x1c7   : > { %v1212_v1 = vpack.c.bf16 %v1208_v54, %v1208_v54  ;;  %v1213_v2 = vpack.c.bf16 %v1209_v55, %v1209_v55  ;;  %v1214_v8 = vpack.c.bf16 %v1210_v6, %v1210_v6  ;;  %v1215_v9 = vpack.c.bf16 %v1211_v7, %v1211_v7 }
 0x23c   : > { %v2275_v38 = vpop.trf.xlu0  ;;  %v2282_v39 = vpop.trf.xlu1 }
 0x23d   : > { %v2279_v40 = vunpack.i.h.bf16 %v2275_v38  ;;  %v2276_v41 = vunpack.i.l.bf16 %v2275_v38  ;;  %v2286_v42 = vunpack.i.h.bf16 %v2282_v39  ;;  %v2283_v43 = vunpack.i.l.bf16 %v2282_v39 }
 0x23f   : > { %v831_v46 = vpack.c.bf16 %v2279_v40, %v2279_v40  ;;  %v830_v47 = vpack.c.bf16 %v2276_v41, %v2276_v41  ;;  %v833_v48 = vpack.c.bf16 %v2286_v42, %v2286_v42  ;;  %v832_v49 = vpack.c.bf16 %v2283_v43, %v2283_v43 }
 0x241   : > { %836 = vst.msk [vmem:[#allocation2 + $0x4] sm:$0xf] %vm834_vm2, %v831_v46  ;;  %835 = vst.msk [vmem:[#allocation2] sm:$0xf] %vm834_vm2, %v830_v47 }
 0x242   : > { %838 = vst.msk [vmem:[#allocation2 + $0xc] sm:$0xf] %vm834_vm2, %v833_v48  ;;  %837 = vst.msk [vmem:[#allocation2 + $0x8] sm:$0xf] %vm834_vm2, %v832_v49 }
 0x248   : > { %v1216_v56 = vld [vmem:[#allocation2] sm:$0xf]  ;;  %v1217_v57 = vld [vmem:[#allocation2 + $0x4] sm:$0xf] }
 0x249   : > { %v1226_v58 = vsel %vm1224_vm3, %v1216_v56, 0  ;;  %v1272_v59 = vsel %vm1224_vm3, %v1217_v57, 0  ;;  %v1218_v60 = vld [vmem:[#allocation2 + $0x8] sm:$0xf]  ;;  %v1219_v61 = vld [vmem:[#allocation2 + $0xc] sm:$0xf] }
 0x24a   : > { %2103 = vmatpush3.bf16.msra.mxu1 %v1226_v58  ;;  %2109 = vmatpush3.bf16.msra.mxu0 %v1272_v59  ;;  %v1318_v4 = vsel %vm1224_vm3, %v1218_v60, 0  ;;  %v1364_v5 = vsel %vm1224_vm3, %v1219_v61, 0 }
 0x24b   : > { %2114 = vmatprep.subr.bf16.mxu1 %v2540_v0  ;;  %2120 = vmatprep.subr.bf16.mxu0 %v2540_v0 }
 0x24d   : > { %2105 = vmatmul.mubr.msk.bf16.vlgmr.msra.gmra.mxu1 %vm1220_vm4, %v1212_v1  ;;  %2111 = vmatmul.mubr.msk.bf16.vlgmr.msra.gmra.mxu0 %vm1220_vm4, %v1213_v2 }
 0x24e   : > { %2115 = vmatpush3.bf16.msra.mxu1 %v1318_v4  ;;  %2121 = vmatpush3.bf16.msra.mxu0 %v1364_v5 }
 0x24f   : > { %2116 = vmatprep.mubr.msk.bf16.mxu1 %vm2541_vm0, %v2540_v0  ;;  %2122 = vmatprep.mubr.msk.bf16.mxu0 %vm2541_vm0, %v2540_v0 }
 0x250   : > { %2126 = vmatprep.subr.bf16.mxu1 %v2540_v0  ;;  %2132 = vmatprep.subr.bf16.mxu0 %v2540_v0 }
 0x255   : > { %2117 = vmatmul.mubr.msk.bf16.vlgmr.msra.gmra.mxu1 %vm1220_vm4, %v1214_v8  ;;  %2123 = vmatmul.mubr.msk.bf16.vlgmr.msra.gmra.mxu0 %vm1220_vm4, %v1215_v9 }
 0x256   : > { %2128 = vmatprep.mubr.msk.bf16.mxu1 %vm2541_vm0, %v2540_v0  ;;  %2134 = vmatprep.mubr.msk.bf16.mxu0 %vm2541_vm0, %v2540_v0 }
 0x30d   : > { %v1262_v14 = vpop.f32.mrf.mxu1  ;;  %v1308_v16 = vpop.f32.mrf.mxu0 }
 0x30e   : > { %v1406_v17 = vsel %vm1220_vm4, %v1262_v14, -inf  ;;  %v1409_v18 = vsel %vm1220_vm4, %v1308_v16, -inf }
 0x30f   : > { %1407 = vmax.xlane.f32.xlu0 %v1406_v17  ;;  %v2106_v19 = vpop.f32.mrf.mxu1  ;;  %1410 = vmax.xlane.f32.xlu1 %v1409_v18  ;;  %v2112_v20 = vpop.f32.mrf.mxu0 }
 0x311   : > { %v1265_v3 = vpop.f32.mrf.mxu1  ;;  %v1311_v21 = vpop.f32.mrf.mxu0 }
 0x313   : > { %v2107_v22 = vpop.f32.mrf.mxu1  ;;  %v2113_v23 = vpop.f32.mrf.mxu0 }
 0x315   : > { %v1354_v24 = vpop.f32.mrf.mxu1  ;;  %v1400_v25 = vpop.f32.mrf.mxu0 }
 0x316   : > { %v1412_v26 = vsel %vm1220_vm4, %v1354_v24, -inf  ;;  %v1415_v31 = vsel %vm1220_vm4, %v1400_v25, -inf }
 0x317   : > { %1413 = vmax.xlane.f32.xlu0 %v1412_v26  ;;  %v2118_v27 = vpop.f32.mrf.mxu1  ;;  %v2124_v15 = vpop.f32.mrf.mxu0 }
 0x319   : > { %v1357_v28 = vpop.f32.mrf.mxu1  ;;  %v1403_v30 = vpop.f32.mrf.mxu0 }
 0x31b   : > { %v2119_v33 = vpop.f32.mrf.mxu1  ;;  %1416 = vmax.xlane.f32.xlu0 %v1415_v31  ;;  %v2125_v34 = vpop.f32.mrf.mxu0 }
 0x320   : > { %840 = vrot.lane.b32.xlu1 %v551_v36, %s2543_s13 }
 0x324   : > { %846 = vrot.lane.b32.xlu1 %v551_v36, %s2542_s7 }
 0x331   : > { %843 = vrot.lane.b32.xlu0 %v551_v36, %s2544_s27  ;;  %s2550_s27 = smov [#allocation13]  }
 0x332   : > { %s2447_s24 = sshll.u32 %s2550_s27, 4  ;;  %s2448_s24 = int_to_ptr.vmem [resolvable:$false] %s2447_s24 }
 0x333   : > { %s2449_s21 = scalar_lea.vmem %s2448_s24, 256  ;;  %p2450_p0 = scmp.lt.s32.totalorder %s2965_s5, %s2448_s24 }
 0x334   : > { %p2451_p8 = scmp.lt.s32.totalorder %s2449_s21, %s2443_s12 }
 0x336   : > { %p2452_p7 = por %p2451_p8, %p2450_p0 }
 0x338   : > { %p2453_p9 = pnand %p2452_p7, %p2446_p5 }
 0x398   : > { %v1408_v37 = vpop.xlane.xlu0 %1407  ;;  %v1411_v38 = vpop.xlane.xlu1 %1410 }
 0x399   : > { %v1418_v39 = vsub.f32 %v1262_v14, %v1408_v37  ;;  %v1419_v40 = vsub.f32 %v1308_v16, %v1411_v38 }
 0x39b   : > { %v1422_v41 = vmul.f32 1.442695, %v1418_v39  ;;  %v1424_v42 = vmul.f32 1.442695, %v1419_v40 }
 0x39c   : > { %v841_v43 = vpop.permute.xlu1 %840 }
 0x39d   : > { %2295 = vpow2.f32 %v1422_v41 }
 0x39e   : > { %2297 = vpow2.f32 %v1424_v42 }
 0x3a0   : > { %v1414_v44 = vpop.xlane.xlu0 %1413  ;;  %v847_v47 = vpop.permute.xlu1 %846 }
 0x3a1   : > { %v1420_v45 = vsub.f32 %v1354_v24, %v1414_v44  ;;  %v865_v50 = vcombine.low %v841_v43, %v847_v47  ;;  %v866_v51 = vcombine.high %v841_v43, %v847_v47 }
 0x3a3   : > { %v1426_v46 = vmul.f32 1.442695, %v1420_v45  ;;  %v873_v57 = vrot.slane %v865_v50, %v2805_v29  ;;  %v880_v59 = vrot.slane %v866_v51, %v2805_v29 }
 0x3a4   : > { %v1417_v48 = vpop.xlane.xlu0 %1416 }
 0x3a5   : > { %2299 = vpow2.f32 %v1426_v46  ;;  %v1421_v49 = vsub.f32 %v1400_v25, %v1417_v48 }
 0x3a7   : > { %v1428_v52 = vmul.f32 1.442695, %v1421_v49 }
 0x3a8   : > { %v844_v53 = vpop.permute.xlu0 %843 }
 0x3a9   : > { %2301 = vpow2.f32 %v1428_v52  ;;  %v849_v54 = vcombine.low %v551_v36, %v844_v53  ;;  %v850_v55 = vcombine.high %v551_v36, %v844_v53 }
 0x3aa   : > { %v2883_v56 = vpop.eup %2295 }
 0x3ab   : > { %v2886_v58 = vpop.eup %2297  ;;  %v857_v60 = vrot.slane %v849_v54, %v2805_v29  ;;  %v864_v61 = vrot.slane %v850_v55, %v2805_v29  ;;  %v1430_v62 = vsel %vm1220_vm4, %v2883_v56, 0.0 }
 0x3ac   : > { %1431 = vadd.xlane.f32.xlu1 %v1430_v62  ;;  %v1433_v63 = vsel %vm1220_vm4, %v2886_v58, 0.0 }
 0x3ad   : > { %v881_v1 = vcombine.low %v857_v60, %v873_v57  ;;  %v882_v2 = vcombine.high %v857_v60, %v873_v57  ;;  %v897_v4 = vcombine.low %v864_v61, %v880_v59  ;;  %v898_v5 = vcombine.high %v864_v61, %v880_v59  ;;  %1434 = vadd.xlane.f32.xlu0 %v1433_v63 }
 0x3af   : > { %v889_v6 = vrot.slane %v881_v1, %v2807_v35  ;;  %v896_v7 = vrot.slane %v882_v2, %v2807_v35  ;;  %v905_v8 = vrot.slane %v897_v4, %v2807_v35  ;;  %v912_v9 = vrot.slane %v898_v5, %v2807_v35 }
 0x3b1   : > { %v917_v10 = vcombine.low %v889_v6, %v896_v7  ;;  %v2024_v11 = vcombine.high %v889_v6, %v896_v7  ;;  %v933_v12 = vcombine.low %v905_v8, %v912_v9  ;;  %v2025_v13 = vcombine.high %v905_v8, %v912_v9 }
 0x3b2   : > { %v2899_v14 = vpop.eup %2299 }
 0x3b3   : > { %v924_v16 = vrot.slane %v917_v10, %v2805_v29  ;;  %v932_v17 = vrot.slane %v2024_v11, %v2805_v29  ;;  %v940_v18 = vrot.slane %v933_v12, %v2805_v29  ;;  %v948_v19 = vrot.slane %v2025_v13, %v2805_v29 }
 0x3b4   : > { %v1436_v20 = vsel %vm1220_vm4, %v2899_v14, 0.0 }
 0x3b5   : > { %v949_v3 = vcombine.low %v924_v16, %v932_v17  ;;  %v950_v21 = vcombine.high %v924_v16, %v932_v17  ;;  %v965_v22 = vcombine.low %v940_v18, %v948_v19  ;;  %v966_v23 = vcombine.high %v940_v18, %v948_v19  ;;  %1437 = vadd.xlane.f32.xlu0 %v1436_v20 }
 0x3b6   : > { %v2302_v24 = vpop.eup %2301 }
 0x3b7   : > { %v957_v25 = vrot.slane %v949_v3, %v2807_v35  ;;  %v964_v26 = vrot.slane %v950_v21, %v2807_v35  ;;  %v973_v27 = vrot.slane %v965_v22, %v2807_v35  ;;  %v980_v15 = vrot.slane %v966_v23, %v2807_v35 }
 0x3b8   : > { %v1439_v28 = vsel %vm1220_vm4, %v2302_v24, 0.0 }
 0x3b9   : > { %v981_v30 = vcombine.low %v957_v25, %v973_v27  ;;  %v982_v31 = vcombine.high %v957_v25, %v973_v27  ;;  %v983_v32 = vcombine.low %v964_v26, %v980_v15  ;;  %v984_v33 = vcombine.high %v964_v26, %v980_v15  ;;  %1440 = vadd.xlane.f32.xlu1 %v1439_v28  ;;  %v2293_v15 = vld [vmem:[#allocation12 + $0x8] sm:$0xff]  }
 0x3bb   : > { %v985_v34 = vpack.c.bf16 %v981_v30, %v981_v30  ;;  %v986_v36 = vpack.c.bf16 %v982_v31, %v982_v31  ;;  %v987_v37 = vpack.c.bf16 %v983_v32, %v983_v32  ;;  %v988_v38 = vpack.c.bf16 %v984_v33, %v984_v33 }
 0x3bd   : > { %989 = vst.msk [vmem:[#allocation3] sm:$0xf] %vm834_vm2, %v985_v34  ;;  %990 = vst.msk [vmem:[#allocation3 + $0x4] sm:$0xf] %vm834_vm2, %v986_v36 }
 0x3be   : > { %991 = vst.msk [vmem:[#allocation3 + $0x8] sm:$0xf] %vm834_vm2, %v987_v37  ;;  %992 = vst.msk [vmem:[#allocation3 + $0xc] sm:$0xf] %vm834_vm2, %v988_v38 }
 0x3c4   : > { %v1454_v39 = vld [vmem:[#allocation3] sm:$0xf]  ;;  %v1455_v40 = vld [vmem:[#allocation3 + $0x4] sm:$0xf] }
 0x3c5   : > { %v1462_v41 = vsel %vm1224_vm3, %v1454_v39, 0  ;;  %v1508_v42 = vsel %vm1224_vm3, %v1455_v40, 0  ;;  %v1456_v51 = vld [vmem:[#allocation3 + $0x8] sm:$0xf]  ;;  %v1457_v53 = vld [vmem:[#allocation3 + $0xc] sm:$0xf] }
 0x3c6   : > { %2127 = vmatpush3.bf16.msra.mxu1 %v1462_v41  ;;  %2133 = vmatpush3.bf16.msra.mxu0 %v1508_v42  ;;  %v1554_v55 = vsel %vm1224_vm3, %v1456_v51, 0  ;;  %v1600_v57 = vsel %vm1224_vm3, %v1457_v53, 0  ;;  %v2294_v39 = vld [vmem:[#allocation12] sm:$0xff]  }
 0x3c7   : > { %2138 = vmatprep.subr.bf16.mxu1 %v2540_v0  ;;  %2144 = vmatprep.subr.bf16.mxu0 %v2540_v0 }
 0x435   : > { %v1432_v43 = vpop.xlane.xlu1 %1431 }
 0x436   : > { %2303 = vrcp.f32 %v1432_v43  ;;  %v1435_v44 = vpop.xlane.xlu0 %1434 }
 0x437   : > { %2305 = vrcp.f32 %v1435_v44 }
 0x43e   : > { %v1438_v45 = vpop.xlane.xlu0 %1437 }
 0x43f   : > { %2307 = vrcp.f32 %v1438_v45 }
 0x442   : > { %v1441_v46 = vpop.xlane.xlu1 %1440 }
 0x443   : > { %v2304_v47 = vpop.eup %2303  ;;  %2309 = vrcp.f32 %v1441_v46 }
 0x444   : > { %v2306_v48 = vpop.eup %2305  ;;  %v1446_v49 = vmul.f32 %v2304_v47, %v2883_v56 }
 0x445   : > { %v1447_v50 = vmul.f32 %v2306_v48, %v2886_v58 }
 0x446   : > { %v1450_v52 = vpack.c.bf16 %v1446_v49, %v1446_v49 }
 0x447   : > { %v1451_v54 = vpack.c.bf16 %v1447_v50, %v1447_v50 }
 0x448   : > { %2129 = vmatmul.mubr.msk.bf16.vlgmr.msra.gmra.mxu1 %vm1220_vm4, %v1450_v52 }
 0x449   : > { %2135 = vmatmul.mubr.msk.bf16.vlgmr.msra.gmra.mxu0 %vm1220_vm4, %v1451_v54  ;;  %2139 = vmatpush3.bf16.msra.mxu1 %v1554_v55 }
 0x44a   : > { %2145 = vmatpush3.bf16.msra.mxu0 %v1600_v57  ;;  %2140 = vmatprep.mubr.msk.bf16.mxu1 %vm2541_vm0, %v2540_v0 }
 0x44b   : > { %2146 = vmatprep.mubr.msk.bf16.mxu0 %vm2541_vm0, %v2540_v0  ;;  %2150 = vmatprep.subr.bf16.mxu1 %v2540_v0 }
 0x44c   : > { %v2308_v56 = vpop.eup %2307 }
 0x44d   : > { %v1448_v58 = vmul.f32 %v2308_v56, %v2899_v14 }
 0x44f   : > { %v1452_v59 = vpack.c.bf16 %v1448_v58, %v1448_v58 }
 0x450   : > { %v2310_v60 = vpop.eup %2309 }
 0x451   : > { %2141 = vmatmul.mubr.msk.bf16.vlgmr.msra.gmra.mxu1 %vm1220_vm4, %v1452_v59  ;;  %v1449_v61 = vmul.f32 %v2310_v60, %v2302_v24  ;;  %v2042_v60 = vld [vmem:[%s3020_s8] ss:$0 sm:$0xff] }
 0x452   : > { %2154 = vmatprep.mubr.msk.bf16.mxu1 %vm2541_vm0, %v2540_v0  ;;  %2151 = vmatpush3.bf16.msra.mxu1 %v2293_v15 }
 0x453   : > { %v1453_v62 = vpack.c.bf16 %v1449_v61, %v1449_v61  ;;  %2152 = vmatprep.subr.bf16.mxu1 %v2540_v0 }
 0x455   : > { %2147 = vmatmul.mubr.msk.bf16.vlgmr.msra.gmra.mxu0 %vm1220_vm4, %v1453_v62 }
 0x456   : > { %2153 = vmatpush3.bf16.msra.mxu1 %v2294_v39 }
 0x508   : > { %v1498_v63 = vpop.f32.mrf.mxu1 }
 0x509   : > { %v1544_v1 = vpop.f32.mrf.mxu0 }
 0x50a   : > { %v2130_v2 = vpop.f32.mrf.mxu1 }
 0x50b   : > { %v2136_v4 = vpop.f32.mrf.mxu0 }
 0x50c   : > { %v1501_v5 = vpop.f32.mrf.mxu1 }
 0x50d   : > { %v1547_v6 = vpop.f32.mrf.mxu0 }
 0x50e   : > { %v2131_v7 = vpop.f32.mrf.mxu1 }
 0x50f   : > { %v2137_v8 = vpop.f32.mrf.mxu0 }
 0x511   : > { %v1590_v9 = vpop.f32.mrf.mxu1 }
 0x512   : > { %v1642_v11 = vcombine.low %v1498_v63, %v1590_v9  ;;  %v1643_v12 = vcombine.high %v1498_v63, %v1590_v9 }
 0x513   : > { %v2142_v10 = vpop.f32.mrf.mxu1 }
 0x514   : > { %v1650_v20 = vrot.slane %v1642_v11, %v2805_v29  ;;  %v1657_v3 = vrot.slane %v1643_v12, %v2805_v29 }
 0x515   : > { %v1593_v13 = vpop.f32.mrf.mxu1  ;;  %v1636_v14 = vpop.f32.mrf.mxu0 }
 0x516   : > { %v1658_v16 = vcombine.low %v1544_v1, %v1636_v14  ;;  %v1659_v17 = vcombine.high %v1544_v1, %v1636_v14 }
 0x517   : > { %v2143_v18 = vpop.f32.mrf.mxu1  ;;  %v2148_v19 = vpop.f32.mrf.mxu0 }
 0x518   : > { %v1666_v21 = vrot.slane %v1658_v16, %v2805_v29  ;;  %v1673_v22 = vrot.slane %v1659_v17, %v2805_v29 }
 0x519   : > { %v1639_v23 = vpop.f32.mrf.mxu0 }
 0x51a   : > { %v1674_v24 = vcombine.low %v1650_v20, %v1666_v21  ;;  %v1675_v25 = vcombine.high %v1650_v20, %v1666_v21  ;;  %v1690_v26 = vcombine.low %v1657_v3, %v1673_v22  ;;  %v1691_v27 = vcombine.high %v1657_v3, %v1673_v22 }
 0x51b   : > { %v2149_v28 = vpop.f32.mrf.mxu0 }
 0x51c   : > { %v1682_v30 = vrot.slane %v1674_v24, %v2807_v35  ;;  %v1689_v31 = vrot.slane %v1675_v25, %v2807_v35  ;;  %v1698_v32 = vrot.slane %v1690_v26, %v2807_v35  ;;  %v1705_v33 = vrot.slane %v1691_v27, %v2807_v35 }
 0x51e   : > { %v1710_v34 = vcombine.low %v1682_v30, %v1689_v31  ;;  %v2040_v36 = vcombine.high %v1682_v30, %v1689_v31  ;;  %v1726_v37 = vcombine.low %v1698_v32, %v1705_v33  ;;  %v2041_v38 = vcombine.high %v1698_v32, %v1705_v33 }
 0x520   : > { %v1717_v40 = vrot.slane %v1710_v34, %v2805_v29  ;;  %v1725_v41 = vrot.slane %v2040_v36, %v2805_v29  ;;  %v1733_v42 = vrot.slane %v1726_v37, %v2805_v29  ;;  %v1741_v43 = vrot.slane %v2041_v38, %v2805_v29 }
 0x522   : > { %v1743_v44 = vcombine.high %v1717_v40, %v1725_v41  ;;  %v1759_v45 = vcombine.high %v1733_v42, %v1741_v43  ;;  %v1742_v46 = vcombine.low %v1717_v40, %v1725_v41  ;;  %v1758_v47 = vcombine.low %v1733_v42, %v1741_v43 }
 0x524   : > { %v1757_v0 = vrot.slane %v1743_v44, %v2807_v35  ;;  %v1773_v48 = vrot.slane %v1759_v45, %v2807_v35  ;;  %v1750_v49 = vrot.slane %v1742_v46, %v2807_v35  ;;  %v1766_v50 = vrot.slane %v1758_v47, %v2807_v35 }
 0x526   : > { %v1776_v51 = vcombine.low %v1757_v0, %v1773_v48  ;;  %v1775_v52 = vcombine.high %v1750_v49, %v1766_v50  ;;  %v1774_v53 = vcombine.low %v1750_v49, %v1766_v50  ;;  %v1777_v29 = vcombine.high %v1757_v0, %v1773_v48 }
 0x528   : > { %1783 = vrot.lane.b32.xlu1 %v1776_v51, %s2547_s26  ;;  %1779 = vrot.lane.b32.xlu0 %v1775_v52, %s2548_s20 }
 0x52c   : > { %1787 = vrot.lane.b32.xlu1 %v1777_v29, %s2549_s19 }
 0x59a   : > { %v1784_v54 = vpop.permute.xlu1 %1783  ;;  %v1780_v55 = vpop.permute.xlu0 %1779 }
 0x59b   : > { %v1790_v57 = vsel %vm1220_vm4, %v1774_v53, %v1780_v55 }
 0x59c   : > { %v1792_v35 = vsel %vm1791_vm5, %v1790_v57, %v1784_v54 }
 0x59e   : > { %v1788_v56 = vpop.permute.xlu1 %1787 }
 0x59f   : > { %v1794_v58 = vsel %vm1793_vm6, %v1792_v35, %v1788_v56 }
 0x5a0   : > { %v1795_v59 = vpack.c.bf16 %v1794_v58, %v1794_v58 }
 0x5a2   : > { %2155 = vmatmul.mubr.msk.bf16.vlgmr.msra.gmra.mxu1 %vm449_vm1, %v1795_v59 }
 0x662   : > { %v1856_v61 = vpop.f32.mrf.mxu1 }
 0x663   : > { %v1857_v62 = vadd.f32 %v2042_v60, %v1856_v61 }
 0x664   : > { %v2156_v63 = vpop.f32.mrf.mxu1 }
 0x665   : > { %1862 = vst.msk [vmem:[%s419_s1] sm:$0xff] %vm449_vm1, %v1857_v62 }
 0x666   : > { %v1859_v1 = vpop.f32.mrf.mxu1 }
 0x667   : > { %2456 = shalt.err (!%p2453_p9)
}
 0x668   : > { %s2457_s26 = scalar_lea.hbm %s2963_s16, 128  ;;  %s2461_s19 = scalar_lea.hbm %s3021_s9, 256 }
 0x669   : > { %p2458_p10 = scmp.ne.s32.totalorder %s2963_s16, %s2457_s26  ;;  %p2462_p13 = scmp.lt.s32.totalorder %s2963_s16, %s3021_s9 }
 0x66a   : > { %p2463_p4 = scmp.lt.s32.totalorder %s2461_s19, %s2457_s26 }
 0x66b   : > { %p2459_p12 = pnand %p2458_p10, %p2723_p2 }
 0x66c   : > { %p2464_p11 = por %p2463_p4, %p2462_p13 }
 0x66d   : > { %p2460_p6 = pneg %p2459_p12 }
 0x66f   : > { %p2465_p1 = pnand %p2464_p11, %p2460_p6 }
 0x671   : > { %2468 = shalt.err (!%p2465_p1)
}
 0x672   : > { %2176 = dma.vmem_to_hbm [thread:$0]  (%p2723_p2), %s2965_s5, 128, %s2963_s16, %s1864_s17   ;;  %v2157_v2 = vpop.f32.mrf.mxu1 }
 0x673 PF: > { %s1890_s25 = sand.u32 1, %s2511_s30   ;;  %p3042_p3 = scmp.ne.s32.totalorder %s3040_s29, 0 }
 0x674   : > { %p3043_p5 = scmp.ge.s32.totalorder %s2531_s14, 2  ;;  %s1891_s18 = scalar_lea.sflag [#allocation6], %s1890_s25 }
 0x676   : > { %p2196_p0 = pnand %p3043_p5, %p3042_p3 }
 0x678   : > { %p2197_p8 = pneg %p2196_p0 }
 0x67a   : > { %2506 = dma.done.wait (%p2197_p8), %s1891_s18, 128  }
 0x67b   : > { %2508 = vsyncadd (%p2197_p8), %s1891_s18, 4294967168  ;;  %s27_s14 = sadd.s32 1, %s2531_s14   ;;  %s3044_s12 = sld [smem:[#allocation18_spill]] }
 0x67c   : > { %p24_p7 = scmp.ge.s32.totalorder %s27_s14, 4   ;;  %s3045_s13 = sld [smem:[#allocation19_spill]] }
 0x67d   : > { %s3046_s30 = smov %s2515_s10  ;;  %s3047_s10 = smov %s2519_s11 }
 0x67e   : > { %s3048_s11 = smov %s2728_s22  ;;  %26 = sbr.rel (!%p24_p7) target bundleno = 13 (0xd), region = 122 }
 0x683   :  { %1896 = vsyncpa [#allocation5], 1 }
 0x684   :  { %1898 = vsyncpa [#allocation5 + $0x1], 1 }
 0x685   :  { %1899 = vsyncpa [#allocation8], 1 }
 0x686   :  { %1900 = vsyncpa [#allocation11], 1 }
 0x687   :  { %1901 = vsyncpa [#allocation6], 1 }
 0x688   :  { %1903 = vsyncpa [#allocation6 + $0x1], 1 }

</bundles_post_ra>
